<compile_context>
chip_gen: v7x
topology: tpu7x:2x2x1
jax: 0.10.0
libtpu: 0.0.40
codegen_flags: <defaults>
</compile_context>

<pallas_src>
import jax
import jax.numpy as jnp
from jax.experimental import pallas as pl
from jax.experimental.pallas import tpu as pltpu


def _round_up(x, m):
    return (x + m - 1) // m * m


def mlp_block_kernel(x_ref, w_ref, b_ref, o_ref, acc_ref):
    # x_ref : (tm, tk)        VMEM  — activation tile (f32 or bf16)
    # w_ref : (tk, tn)        VMEM  — weight tile, already transposed to (d_in, d_out)
    # b_ref : (1,  tn)  f32   VMEM  — bias tile
    # o_ref : (tm, tn)  out   VMEM  — output tile (resident across K)
    # acc_ref: (tm, tn) f32   VMEM scratch accumulator
    k = pl.program_id(2)

    @pl.when(k == 0)
    def _init():
        # Bias-initialized accumulator: finalize tail is then just ReLU + cast.
        acc_ref[...] = jnp.broadcast_to(b_ref[...], acc_ref.shape)

    # bf16 MXU matmul (cast is a no-op if the operand is already bf16),
    # f32 accumulation.  Plain row-major contraction -> no in-kernel transpose.
    acc_ref[...] += jnp.dot(
        x_ref[...].astype(jnp.bfloat16),
        w_ref[...].astype(jnp.bfloat16),
        preferred_element_type=jnp.float32,
    )

    @pl.when(k == pl.num_programs(2) - 1)
    def _finalize():
        o_ref[...] = jnp.maximum(acc_ref[...], 0.0).astype(o_ref.dtype)
        # TODO(synk): batch_norm / dropout are disabled in the default module
        # config (batch_norm=False, dropout=0.0) and are not implemented here.


def mlp_block_forward(x, weight, bias, *, tm=512, tn=512, tk=1024, out_dtype=None):
    """x: (B, D_in); weight: (D_out, D_in) [PyTorch layout]; bias: (D_out,)."""
    B, d_in = x.shape
    d_out, d_in_w = weight.shape
    assert d_in_w == d_in, "weight/input dim mismatch"
    out_dtype = out_dtype if out_dtype is not None else x.dtype

    # Clamp tiles to the (TPU-padded) problem size: sublane granularity 8 on M,
    # lane granularity 128 on N and K (keeps output stores lane-dense).
    tm = min(tm, _round_up(B, 8))
    tn = min(tn, _round_up(d_out, 128))
    tk = min(tk, _round_up(d_in, 128))

    # Megacore (v7x): if the parallel (i, j) grid would be 1x1, split one
    # parallel axis so both TensorCores get work.  No-op when alignment or the
    # problem size forbids it; harmless on single-TC chips.
    if (_round_up(B, tm) // tm) * (_round_up(d_out, tn) // tn) == 1:
        if tm >= 16 and tm % 16 == 0:
            tm //= 2
        elif tn >= 256:
            tn //= 2

    Bp = _round_up(B, tm)
    d_out_p = _round_up(d_out, tn)
    d_in_p = _round_up(d_in, tk)
    grid = (Bp // tm, d_out_p // tn, d_in_p // tk)   # K (reduction) last

    # --- operand prep (pad only when needed; cast in the wrapper only when the
    # grid re-read factor makes it pay off, otherwise cast inside the kernel).
    x_reuse = grid[1]    # x is re-read once per N tile
    w_reuse = grid[0]    # W is re-read once per M tile

    x_p = x
    if (Bp, d_in_p) != (B, d_in):
        x_p = jnp.pad(x, ((0, Bp - B), (0, d_in_p - d_in)))
    if x_reuse >= 3 and jnp.dtype(x_p.dtype).itemsize > 2:
        x_p = x_p.astype(jnp.bfloat16)

    # One-time transpose of the static weight to (d_in, d_out): the kernel then
    # does a plain row-major dot (no per-step XLU transpose on the MXU path).
    wt = weight.T
    if (d_in_p, d_out_p) != (d_in, d_out):
        wt = jnp.pad(wt, ((0, d_in_p - d_in), (0, d_out_p - d_out)))
    if w_reuse >= 3 and jnp.dtype(wt.dtype).itemsize > 2:
        wt = wt.astype(jnp.bfloat16)

    b_p = bias if d_out_p == d_out else jnp.pad(bias, (0, d_out_p - d_out))
    b2 = b_p.reshape(1, d_out_p).astype(jnp.float32)

    # --- VMEM budget: double-buffered x/W/bias/out + f32 accumulator.
    x_bytes = jnp.dtype(x_p.dtype).itemsize
    w_bytes = jnp.dtype(wt.dtype).itemsize
    o_bytes = jnp.dtype(out_dtype).itemsize
    step_bytes = (2 * (tm * tk * x_bytes + tk * tn * w_bytes + tn * 4)
                  + 2 * tm * tn * o_bytes + tm * tn * 4)
    # >= 32 MiB (beats the low default scoped limit, esp. v5e's 16 MiB) but
    # capped at 48 MiB so v7x's 64 MiB physical VMEM keeps headroom.
    vmem_limit = int(min(max(32 << 20, 2 * step_bytes), 48 << 20))

    cost = pl.CostEstimate(
        flops=2 * Bp * d_in_p * d_out_p,
        transcendentals=0,
        bytes_accessed=(x_p.size * x_bytes * grid[1]        # x re-read per N tile
                        + wt.size * w_bytes * grid[0]       # W re-read per M tile
                        + b2.size * 4 * grid[0]
                        + Bp * d_out_p * o_bytes),
    )

    out_p = pl.pallas_call(
        mlp_block_kernel,
        out_shape=jax.ShapeDtypeStruct((Bp, d_out_p), out_dtype),
        grid_spec=pltpu.PrefetchScalarGridSpec(
            num_scalar_prefetch=0,
            grid=grid,
            in_specs=[
                pl.BlockSpec((tm, tk), lambda i, j, k: (i, k)),   # x tile
                pl.BlockSpec((tk, tn), lambda i, j, k: (k, j)),   # W.T tile
                pl.BlockSpec((1, tn), lambda i, j, k: (0, j)),    # bias tile
            ],
            out_specs=pl.BlockSpec((tm, tn), lambda i, j, k: (i, j)),
            scratch_shapes=[pltpu.VMEM((tm, tn), jnp.float32)],
        ),
        compiler_params=pltpu.CompilerParams(
            dimension_semantics=("parallel", "parallel", "arbitrary"),
            vmem_limit_bytes=vmem_limit,
        ),
        cost_estimate=cost,
    )(x_p, wt, b2)

    return out_p[:B, :d_out]


def init_mlp_block_params(key, input_dim, output_dim, dtype=jnp.float32):
    """xavier_uniform weight (PyTorch convention, shape (output_dim, input_dim)),
    bias = 0 (as in the module)."""
    bound = jnp.sqrt(6.0 / (input_dim + output_dim))
    weight = jax.random.uniform(
        key, (output_dim, input_dim), dtype=dtype, minval=-bound, maxval=bound
    )
    bias = jnp.zeros((output_dim,), dtype=dtype)
    return weight, bias


def _reference(x, weight, bias):
    """Pure-JAX reference with the same bf16-input / f32-accumulate numerics."""
    xb = x.astype(jnp.bfloat16).astype(jnp.float32)
    wb = weight.astype(jnp.bfloat16).astype(jnp.float32)
    y = jax.lax.dot_general(
        xb, wb,
        dimension_numbers=(((1,), (1,)), ((), ())),
        precision=jax.lax.Precision.HIGHEST,
        preferred_element_type=jnp.float32,
    ) + bias
    return jnp.maximum(y, 0.0)


if __name__ == "__main__":
    key = jax.random.PRNGKey(0)
    k_x, k_w, k_b = jax.random.split(key, 3)

    # Case 1: small / lane-sparse dims with a non-zero bias — exercises the
    # zero-padding path and the bias-initialized accumulator + ReLU epilogue.
    batch, input_dim, output_dim = 8, 32, 32
    x = jax.random.normal(k_x, (batch, input_dim), dtype=jnp.float32)
    weight, _ = init_mlp_block_params(k_w, input_dim, output_dim)
    bias = 0.1 * jax.random.normal(k_b, (output_dim,), dtype=jnp.float32)

    out = jax.block_until_ready(mlp_block_forward(x, weight, bias))
    ref = _reference(x, weight, bias)
    assert out.shape == (batch, output_dim)
    assert jnp.allclose(out, ref, atol=1e-2, rtol=1e-2), float(
        jnp.max(jnp.abs(out - ref)))

    # Case 2: explicit small tiles on a modest problem — exercises the full
    # (2, 2, 2) grid, the K-accumulation path, and the megacore grid split.
    batch2, in2, out2 = 256, 512, 256
    x2 = jax.random.normal(k_x, (batch2, in2), dtype=jnp.float32)
    w2, b2 = init_mlp_block_params(k_w, in2, out2)

    o2 = jax.block_until_ready(
        mlp_block_forward(x2, w2, b2, tm=128, tn=128, tk=256))
    ref2 = _reference(x2, w2, b2)
    assert o2.shape == (batch2, out2)
    assert jnp.allclose(o2, ref2, atol=1e-2, rtol=1e-2), float(
        jnp.max(jnp.abs(o2 - ref2)))

    print("KERNEL_OK")
</pallas_src>

<mosaic_0001>
module attributes {stable_mosaic.version = 11 : i64} {
  func.func @mlp_block_kernel(%arg0: i32, %arg1: i32, %arg2: i32, %arg3: memref<8x128xf32, #tpu.memory_space<vmem>>, %arg4: memref<128x128xf32, #tpu.memory_space<vmem>>, %arg5: memref<1x128xf32, #tpu.memory_space<vmem>>, %arg6: memref<8x128xf32, #tpu.memory_space<vmem>>, %arg7: memref<8x128xf32, #tpu.memory_space<vmem>>) attributes {dimension_semantics = [#tpu.dimension_semantics<parallel>, #tpu.dimension_semantics<parallel>, #tpu.dimension_semantics<arbitrary>], iteration_bounds = array<i64: 1, 1, 1>, scalar_prefetch = 0 : i64, scratch_operands = 1 : i64, tpu.core_type = #tpu.core_type<tc>, window_params = [{transform_indices = @transform_0, window_bounds = array<i64: 8, 128>}, {transform_indices = @transform_1, window_bounds = array<i64: 128, 128>}, {transform_indices = @transform_2, window_bounds = array<i64: 1, 128>}, {transform_indices = @transform_3, window_bounds = array<i64: 8, 128>}]} {
    %c0_i32 = arith.constant 0 : i32
    %0 = arith.cmpi eq, %arg2, %c0_i32 : i32
    %1 = arith.extui %0 : i1 to i32
    %c0_i32_0 = arith.constant 0 : i32
    %2 = arith.cmpi ne, %1, %c0_i32_0 : i32
    scf.if %2 {
      %c0_10 = arith.constant 0 : index
      %c0_11 = arith.constant 0 : index
      %14 = vector.load %arg5[%c0_10, %c0_11] : memref<1x128xf32, #tpu.memory_space<vmem>>, vector<1x128xf32>
      %15 = vector.shape_cast %14 : vector<1x128xf32> to vector<1x128xf32>
      %16 = vector.broadcast %15 : vector<1x128xf32> to vector<8x128xf32>
      %c0_12 = arith.constant 0 : index
      %c0_13 = arith.constant 0 : index
      %17 = vector.load %arg7[%c0_12, %c0_13] : memref<8x128xf32, #tpu.memory_space<vmem>>, vector<8x128xf32>
      tpu.vector_store %arg7[%c0_12, %c0_13], %16 {strides = array<i32>} : memref<8x128xf32, #tpu.memory_space<vmem>>, vector<8x128xf32>,
    } else {
    }
    %c0 = arith.constant 0 : index
    %c0_1 = arith.constant 0 : index
    %3 = vector.load %arg7[%c0, %c0_1] : memref<8x128xf32, #tpu.memory_space<vmem>>, vector<8x128xf32>
    %c0_2 = arith.constant 0 : index
    %c0_3 = arith.constant 0 : index
    %4 = vector.load %arg3[%c0_2, %c0_3] : memref<8x128xf32, #tpu.memory_space<vmem>>, vector<8x128xf32>
    %5 = arith.truncf %4 : vector<8x128xf32> to vector<8x128xbf16>
    %c0_4 = arith.constant 0 : index
    %c0_5 = arith.constant 0 : index
    %6 = vector.load %arg4[%c0_4, %c0_5] : memref<128x128xf32, #tpu.memory_space<vmem>>, vector<128x128xf32>
    %7 = arith.truncf %6 : vector<128x128xf32> to vector<128x128xbf16>
    %cst = arith.constant dense<0.000000e+00> : vector<8x128xf32>
    %8 = tpu.matmul %5, %7, %cst {dimension_numbers = #tpu.dot_dimension_numbers<[1], [0], [0], [1], [0, 0, 1, 1], [], []>} : vector<8x128xbf16>, vector<128x128xbf16>, vector<8x128xf32> -> vector<8x128xf32>
    %9 = arith.addf %3, %8 : vector<8x128xf32>
    %c0_6 = arith.constant 0 : index
    %c0_7 = arith.constant 0 : index
    %10 = vector.load %arg7[%c0_6, %c0_7] : memref<8x128xf32, #tpu.memory_space<vmem>>, vector<8x128xf32>
    tpu.vector_store %arg7[%c0_6, %c0_7], %9 {strides = array<i32>} : memref<8x128xf32, #tpu.memory_space<vmem>>, vector<8x128xf32>,
    %c0_i32_8 = arith.constant 0 : i32
    %11 = arith.cmpi eq, %arg2, %c0_i32_8 : i32
    %12 = arith.extui %11 : i1 to i32
    %c0_i32_9 = arith.constant 0 : i32
    %13 = arith.cmpi ne, %12, %c0_i32_9 : i32
    scf.if %13 {
      %c0_10 = arith.constant 0 : index
      %c0_11 = arith.constant 0 : index
      %14 = vector.load %arg7[%c0_10, %c0_11] : memref<8x128xf32, #tpu.memory_space<vmem>>, vector<8x128xf32>
      %cst_12 = arith.constant 0.000000e+00 : f32
      %15 = vector.broadcast %cst_12 : f32 to vector<8x128xf32>
      %16 = arith.maximumf %14, %15 : vector<8x128xf32>
      %c0_13 = arith.constant 0 : index
      %c0_14 = arith.constant 0 : index
      %17 = vector.load %arg6[%c0_13, %c0_14] : memref<8x128xf32, #tpu.memory_space<vmem>>, vector<8x128xf32>
      tpu.vector_store %arg6[%c0_13, %c0_14], %16 {strides = array<i32>} : memref<8x128xf32, #tpu.memory_space<vmem>>, vector<8x128xf32>,
    } else {
    }
    return
  }
  func.func @transform_0(%arg0: i32, %arg1: i32, %arg2: i32) -> (i32, i32) {
    %c0_i32 = arith.constant 0 : i32
    return %arg0, %arg2 : i32, i32
  }
  func.func @transform_1(%arg0: i32, %arg1: i32, %arg2: i32) -> (i32, i32) {
    %c0_i32 = arith.constant 0 : i32
    return %arg2, %arg1 : i32, i32
  }
  func.func @transform_2(%arg0: i32, %arg1: i32, %arg2: i32) -> (i32, i32) {
    %c0_i32 = arith.constant 0 : i32
    %c0_i32_0 = arith.constant 0 : i32
    return %c0_i32, %arg1 : i32, i32
  }
  func.func @transform_3(%arg0: i32, %arg1: i32, %arg2: i32) -> (i32, i32) {
    %c0_i32 = arith.constant 0 : i32
    return %arg0, %arg1 : i32, i32
  }
}

</mosaic_0001>

<bundles_post_ra>
// kernel: tpu_custom_call.1
= control target key start
LH: loop header
LB: loop body
LE: loop exit
PB: predicated region body
PF: predicated region fallthrough
CT: control target
= control target key end

     0   :  { %8 = vsyncpa [#allocation4], 0  ;;  %s327_s0 = inlined_call_operand.hbm [shape: f32[8,128], index: 0, kind: input, shape index: {}]   ;;  %s328_s1 = inlined_call_operand.hbm [shape: f32[128,128], index: 1, kind: input, shape index: {}]   ;;  %s329_s2 = inlined_call_operand.vmem [shape: f32[1,128], index: 2, kind: input, shape index: {}]   ;;  %s330_s3 = inlined_call_operand.hbm [shape: f32[8,128], index: 3, kind: output, shape index: {}]  }
   0x1   :  { %9 = vsyncpa [#allocation7], 0 }
   0x2   :  { %10 = vsyncpa [#allocation5], 0  ;;  %s254_s12 = smov [#allocation3]   ;;  %s255_s14 = smov [#allocation6]  }
   0x3   :  { %s17_s13 = sshll.u32 %s254_s12, 4  ;;  %s26_s15 = sshll.u32 %s255_s14, 4  ;;  %s18_s13 = int_to_ptr.vmem [resolvable:$true] %s17_s13  ;;  %s281_s15 = int_to_ptr.vmem [resolvable:$true] %s26_s15 }
   0x4   :  { %s182_s18 = scalar_lea.hbm %s327_s0, 128 }
   0x5   :  { %p183_p0 = scmp.ne.s32.totalorder %s327_s0, %s182_s18  ;;  %p186_p1 = scmp.lt.u32.totalorder %s182_s18, %s327_s0 }
   0x7   :  { %p188_p2 = pnand %p186_p1, %p183_p0 }
   0x9   :  { %191 = shalt.err (!%p188_p2)
}
   0xa   :  { %s192_s23 = scalar_lea.vmem %s18_s13, 128  ;;  %p197_p4 = scmp.lt.s32.totalorder %s18_s13, %s18_s13 }
   0xb   :  { %p193_p3 = scmp.ne.s32.totalorder %s18_s13, %s192_s23  ;;  %p198_p5 = scmp.lt.s32.totalorder %s192_s23, %s192_s23 }
   0xd   :  { %p199_p6 = por %p198_p5, %p197_p4 }
   0xf   :  { %p200_p7 = pnand %p199_p6, %p193_p3 }
  0x11   :  { %203 = shalt.err (!%p200_p7)
}
  0x12   :  { %20 = dma.hbm_to_vmem [thread:$0]  %s327_s0, 128, %s18_s13, [#allocation4]  }
  0x13   :  { %s204_s28 = scalar_lea.hbm %s328_s1, 2048 }
  0x14   :  { %p205_p8 = scmp.ne.s32.totalorder %s328_s1, %s204_s28  ;;  %p208_p9 = scmp.lt.u32.totalorder %s204_s28, %s328_s1 }
  0x16   :  { %p210_p10 = pnand %p208_p9, %p205_p8 }
  0x18   :  { %213 = shalt.err (!%p210_p10)
}
  0x19   :  { %s214_s6 = scalar_lea.vmem %s281_s15, 2048  ;;  %p219_p12 = scmp.lt.s32.totalorder %s281_s15, %s281_s15 }
  0x1a   :  { %p215_p11 = scmp.ne.s32.totalorder %s281_s15, %s214_s6  ;;  %p220_p13 = scmp.lt.s32.totalorder %s214_s6, %s214_s6 }
  0x1c   :  { %p221_p0 = por %p220_p13, %p219_p12 }
  0x1e   :  { %p222_p1 = pnand %p221_p0, %p215_p11 }
  0x20   :  { %225 = shalt.err (!%p222_p1)
}
  0x21   :  { %s256_s0 = smov 128   ;;  %s257_s7 = smov 8  }
  0x22   :  { %32 = dma.hbm_to_vmem [thread:$0]  %s328_s1, 2048, %s281_s15, [#allocation7], %s256_s0, %s256_s0, %s257_s7  }
  0x23   :  { %248 = dma.done.wait [#allocation4], 128  }
  0x24   :  { %249 = vsyncadd [#allocation4], 4294967168 }
  0x25   :  { %250 = dma.done.wait [#allocation7], 2048  }
  0x26   :  { %251 = vsyncadd [#allocation7], 4294965248  ;;  %v258_v0 = vmov 0.0   ;;  %vm259_vm0 = vmmov 0   ;;  %v57_v1 = vld [vmem:[#allocation6] sm:$0xff]  ;;  %v58_v2 = vld [vmem:[#allocation6 + $0x8] sm:$0xff] }
  0x27   :  { %155 = vmatprep.subr.bf16.mxu0 %v258_v0  ;;  %171 = vmatprep.mubr.msk.bf16.mxu0 %vm259_vm0, %v258_v0  ;;  %v59_v3 = vld [vmem:[#allocation6 + $0x10] sm:$0xff]  ;;  %v73_v4 = vpack.c.bf16 %v58_v2, %v57_v1  ;;  %v60_v5 = vld [vmem:[#allocation6 + $0x18] sm:$0xff]  ;;  %v61_v7 = vld [vmem:[#allocation6 + $0x20] sm:$0xff]  ;;  %s260_s11 = smov [#allocation8]  }
  0x28   :  { %v74_v6 = vpack.c.bf16 %v60_v5, %v59_v3  ;;  %v62_v8 = vld [vmem:[#allocation6 + $0x28] sm:$0xff]  ;;  %v63_v10 = vld [vmem:[#allocation6 + $0x30] sm:$0xff]  ;;  %v64_v11 = vld [vmem:[#allocation6 + $0x38] sm:$0xff]  ;;  %s135_s12 = sshll.u32 %s260_s11, 4  ;;  %s136_s12 = int_to_ptr.vmem [resolvable:$true] %s135_s12 }
  0x29   :  { %156 = vmatpush3.bf16.msra.mxu0 %v73_v4  ;;  %v75_v9 = vpack.c.bf16 %v62_v8, %v61_v7  ;;  %v76_v12 = vpack.c.bf16 %v64_v11, %v63_v10  ;;  %v65_v13 = vld [vmem:[#allocation6 + $0x40] sm:$0xff]  ;;  %v66_v14 = vld [vmem:[#allocation6 + $0x48] sm:$0xff]  ;;  %v67_v16 = vld [vmem:[#allocation6 + $0x50] sm:$0xff]  ;;  %s226_s13 = scalar_lea.vmem %s136_s12, 128  ;;  %p231_p3 = scmp.lt.s32.totalorder %s136_s12, %s136_s12 }
  0x2a   :  { %157 = vmatprep.subr.bf16.mxu0 %v258_v0  ;;  %v77_v15 = vpack.c.bf16 %v66_v14, %v65_v13  ;;  %v68_v17 = vld [vmem:[#allocation6 + $0x58] sm:$0xff]  ;;  %v69_v19 = vld [vmem:[#allocation6 + $0x60] sm:$0xff]  ;;  %v70_v20 = vld [vmem:[#allocation6 + $0x68] sm:$0xff]  ;;  %p227_p2 = scmp.ne.s32.totalorder %s136_s12, %s226_s13  ;;  %p232_p4 = scmp.lt.s32.totalorder %s226_s13, %s226_s13 }
  0x2b   :  { %v78_v18 = vpack.c.bf16 %v68_v17, %v67_v16  ;;  %v79_v21 = vpack.c.bf16 %v70_v20, %v69_v19  ;;  %v71_v22 = vld [vmem:[#allocation6 + $0x70] sm:$0xff]  ;;  %v72_v23 = vld [vmem:[#allocation6 + $0x78] sm:$0xff] }
  0x2c   :  { %v80_v24 = vpack.c.bf16 %v72_v23, %v71_v22  ;;  %v55_v25 = vld [vmem:[#allocation3] sm:$0xff]  ;;  %p233_p5 = por %p232_p4, %p231_p3 }
  0x2d   :  { %158 = vmatpush3.bf16.msra.mxu0 %v74_v6  ;;  %v56_v26 = vpack.c.bf16 %v55_v25, %v55_v25  ;;  %v145_v27 = vld [vmem:[%s329_s2] ss:$0 sm:$0xff] }
  0x2e   :  { %159 = vmatprep.subr.bf16.mxu0 %v258_v0  ;;  %p234_p6 = pnand %p233_p5, %p227_p2 }
  0x31   :  { %160 = vmatpush3.bf16.msra.mxu0 %v75_v9 }
  0x32   :  { %161 = vmatprep.subr.bf16.mxu0 %v258_v0 }
  0x35   :  { %162 = vmatpush3.bf16.msra.mxu0 %v76_v12 }
  0x36   :  { %163 = vmatprep.subr.bf16.mxu0 %v258_v0 }
  0x39   :  { %164 = vmatpush3.bf16.msra.mxu0 %v77_v15 }
  0x3a   :  { %165 = vmatprep.subr.bf16.mxu0 %v258_v0 }
  0x3d   :  { %166 = vmatpush3.bf16.msra.mxu0 %v78_v18 }
  0x3e   :  { %167 = vmatprep.subr.bf16.mxu0 %v258_v0 }
  0x41   :  { %168 = vmatpush3.bf16.msra.mxu0 %v79_v21 }
  0x42   :  { %169 = vmatprep.subr.bf16.mxu0 %v258_v0 }
  0x45   :  { %170 = vmatpush3.bf16.msra.mxu0 %v80_v24 }
  0x48   :  { %172 = vmatmul.mubr.bf16.vlgmr.msra.gmra.mrb[0].mxu0 %v56_v26 }
 0x11b   :  { %v115_v28 = vpop.f32.mrb[0].mxu0 }
 0x11c   :  { %v121_v29 = vadd.f32 %v145_v27, %v115_v28  ;;  %v173_v30 = vpop.f32.mrb[1].mxu0 }
 0x11d   :  { %v118_v31 = vpop.f32.mrb[2].mxu0 }
 0x11e   :  { %v127_v32 = vmax.f32 %v121_v29, 0.0  ;;  %v174_v33 = vpop.f32.mrb[3].mxu0 }
 0x120   :  { %128 = vst [vmem:[#allocation8] sm:$0xff] %v127_v32 }
 0x121   :  { %237 = shalt.err (!%p234_p6)
}
 0x122   :  { %s238_s2 = scalar_lea.hbm %s330_s3, 128 }
 0x123   :  { %p239_p7 = scmp.ne.s32.totalorder %s330_s3, %s238_s2  ;;  %p242_p8 = scmp.lt.u32.totalorder %s238_s2, %s330_s3 }
 0x125   :  { %p244_p9 = pnand %p242_p8, %p239_p7 }
 0x127   :  { %247 = shalt.err (!%p244_p9)
}
 0x128   :  { %138 = dma.vmem_to_hbm [thread:$0]  %s136_s12, 128, %s330_s3, [#allocation5]  }
 0x129   :  { %252 = dma.done.wait [#allocation5], 128  }
 0x12a   :  { %253 = vsyncadd [#allocation5], 4294967168 }
 0x12b   :  { %142 = vsyncpa [#allocation4], 1 }
 0x12c   :  { %143 = vsyncpa [#allocation7], 1 }
 0x12d   :  { %144 = vsyncpa [#allocation5], 1 }

</bundles_post_ra>
